<compile_context>
chip_gen: v5e
topology: v5e:2x2
jax: 0.10.0
libtpu: 0.0.40
codegen_flags: <defaults>
</compile_context>

<pallas_src>
import functools

import jax
import jax.numpy as jnp
import numpy as np
from jax.experimental import pallas as pl
from jax.experimental.pallas import tpu as pltpu

NEG_SLOPE = 0.01


def _leaky(x, ns=NEG_SLOPE):
    return jnp.where(x >= 0, x, ns * x)


# ------------------------------ fused Pallas kernel -------------------------------- #
def _fused_extractor_kernel(*refs, layer_meta, negative_slope):
    # refs = (x_ref, c_ref, *per-layer param refs..., out_ref); no scratch.
    x_ref, c_ref = refs[0], refs[1]
    out_ref = refs[-1]
    params = refs[2:-1]

    x = x_ref[...]
    c = c_ref[...]
    n = x.shape[0]
    ones = jnp.ones((n, 1), jnp.float32)          # hoisted: reused by every layer

    idx = 0
    for meta in layer_meta:                        # static unroll over depth
        nb = meta["num_basis"]
        dout = meta["dim_out"]
        has_sc = meta["has_shortcut"]
        if has_sc:
            w0, b0, w1, b1, w2, b2, W_op, W_sc = params[idx:idx + 8]
            idx += 8
        else:
            w0, b0, w1, b1, w2, b2, W_op = params[idx:idx + 7]
            W_sc = None
            idx += 7

        # Basis-function MLP on c:  Linear -> dense resnet block -> LeakyReLU -> Linear.
        # When a shortcut exists, its MLP weights were concatenated/block-diagonalized at
        # prep time, so this ONE set of matmuls produces both bf_op and bf_sc.
        h0 = jnp.dot(c, w0[...], preferred_element_type=jnp.float32) + b0[...]
        h1 = h0 + (jnp.dot(_leaky(h0, negative_slope), w1[...],
                           preferred_element_type=jnp.float32) + b1[...])
        bf = jnp.dot(_leaky(h1, negative_slope), w2[...],
                     preferred_element_type=jnp.float32) + b2[...]   # (N, nb) or (N, 2*nb)

        # op branch (ConditionalPreactivation): LeakyReLU(x) then conditional linear.
        # Bias is folded into the single lane-dense matmul via the ones column:
        #   out = sum_b bf_b * (x_aug @ W_aug_b),   W_aug_b = [W_b ; Bias_b]
        xa = jnp.concatenate([_leaky(x, negative_slope), ones], axis=1)
        y_op = jnp.dot(xa, W_op[...], preferred_element_type=jnp.float32)  # (N, nb*dout)
        bf_op = bf[:, :nb]
        acc = bf_op[:, 0:1] * y_op[:, 0:dout]
        for b in range(1, nb):                       # VPU mul/add over contiguous chunks
            acc = acc + bf_op[:, b:b + 1] * y_op[:, b * dout:(b + 1) * dout]

        if has_sc:                                   # projection shortcut (layer 0)
            bf_sc = bf[:, nb:2 * nb]
            xs = jnp.concatenate([x, ones], axis=1)
            y_sc = jnp.dot(xs, W_sc[...], preferred_element_type=jnp.float32)
            for b in range(nb):
                acc = acc + bf_sc[:, b:b + 1] * y_sc[:, b * dout:(b + 1) * dout]
            x = acc
        else:                                        # ConditionalIdentity; Dropout(p=0) = id
            x = acc + x

    out_ref[...] = _leaky(x, negative_slope)         # activate_output=True


# ------------------------------ parameter preparation ------------------------------ #
def _block_diag(a, b):
    ra, ca = a.shape
    rb, cb = b.shape
    top = jnp.concatenate([a, jnp.zeros((ra, cb), a.dtype)], axis=1)
    bot = jnp.concatenate([jnp.zeros((rb, ca), b.dtype), b], axis=1)
    return jnp.concatenate([top, bot], axis=0)


def _flatten_cond_weight(W, Bias):
    # W: (nb, d_in, d_out), Bias: (nb, d_out)
    #   -> (d_in + 1, nb * d_out) with the bias folded in as the last input row and
    #      columns laid out so chunk b occupies lanes [b*d_out, (b+1)*d_out).
    nb, d_in, d_out = W.shape
    W_aug = jnp.concatenate([W, Bias[:, None, :]], axis=1)          # (nb, d_in+1, d_out)
    return jnp.transpose(W_aug, (1, 0, 2)).reshape(d_in + 1, nb * d_out)


def prepare_fused_params(layers):
    """One-time prep: reshape / fuse all per-layer parameters for the fused kernel."""
    metas, arrays = [], []
    for layer in layers:
        op, sc = layer["op"], layer["shortcut"]
        nb, _, d_out = op["W"].shape
        has_sc = sc is not None
        if has_sc:
            lw = [jnp.concatenate([op["w0"], sc["w0"]], axis=1),
                  jnp.concatenate([op["b0"], sc["b0"]], axis=1),
                  _block_diag(op["w1"], sc["w1"]),
                  jnp.concatenate([op["b1"], sc["b1"]], axis=1),
                  _block_diag(op["w2"], sc["w2"]),
                  jnp.concatenate([op["b2"], sc["b2"]], axis=1),
                  _flatten_cond_weight(op["W"], op["Bias"]),
                  _flatten_cond_weight(sc["W"], sc["Bias"])]
        else:
            lw = [op["w0"], op["b0"], op["w1"], op["b1"], op["w2"], op["b2"],
                  _flatten_cond_weight(op["W"], op["Bias"])]
        metas.append(dict(num_basis=int(nb), dim_out=int(d_out), has_shortcut=has_sc))
        arrays.extend(lw)
    return metas, arrays


# ------------------------------ forward (Pallas-backed) ----------------------------- #
def _padded_bytes(shape, itemsize=4):
    if len(shape) == 1:
        r, c = 1, shape[0]
    else:
        r, c = int(np.prod(shape[:-1])), shape[-1]
    return (-(-r // 8) * 8) * (-(-c // 128) * 128) * itemsize


def conditional_feature_extractor(x, c, fused_params):
    metas, arrays = fused_params
    n = x.shape[0]
    dim_out = metas[-1]["dim_out"]
    inputs = [x, c] + list(arrays)

    kernel = functools.partial(_fused_extractor_kernel,
                               layer_meta=metas, negative_slope=NEG_SLOPE)

    io_bytes = sum(int(np.prod(a.shape)) * 4 for a in inputs) + n * dim_out * 4
    padded = sum(_padded_bytes(a.shape) for a in inputs) + _padded_bytes((n, dim_out))
    vmem_limit = int(min(64 * 1024 * 1024, max(8 * padded, 2 * 1024 * 1024)))
    flops = sum(2 * n * a.shape[0] * a.shape[1]
                for a in arrays if a.ndim == 2 and a.shape[0] > 1)

    vmem = pl.BlockSpec(memory_space=pltpu.MemorySpace.VMEM)
    return pl.pallas_call(
        kernel,
        out_shape=jax.ShapeDtypeStruct((n, dim_out), jnp.float32),
        in_specs=[vmem] * len(inputs),
        out_specs=vmem,
        compiler_params=pltpu.CompilerParams(vmem_limit_bytes=vmem_limit),
        cost_estimate=pl.CostEstimate(flops=int(flops), transcendentals=0,
                                      bytes_accessed=int(io_bytes)),
    )(*inputs)


# --------------------------------- parameter init ----------------------------------- #
def _uniform(key, shape, bound):
    return jax.random.uniform(key, shape, jnp.float32, -bound, bound)


def init_cond_linear(key, dim_input, dim_condition, dim_output, num_basis, dim_basis):
    ks = jax.random.split(key, 8)
    bnd_c = 1.0 / np.sqrt(dim_condition)
    bnd_f = 1.0 / np.sqrt(dim_basis)
    bnd_i = 1.0 / np.sqrt(dim_input)
    return dict(
        w0=_uniform(ks[0], (dim_condition, dim_basis), bnd_c),
        b0=_uniform(ks[1], (1, dim_basis), bnd_c),
        w1=_uniform(ks[2], (dim_basis, dim_basis), bnd_f),
        b1=_uniform(ks[3], (1, dim_basis), bnd_f),
        w2=_uniform(ks[4], (dim_basis, num_basis), bnd_f),
        b2=_uniform(ks[5], (1, num_basis), bnd_f),
        W=_uniform(ks[6], (num_basis, dim_input, dim_output), bnd_i),
        Bias=_uniform(ks[7], (num_basis, dim_output), bnd_i),
    )


def init_feature_extractor(key, dim_input, dim_condition, dim_hidden, depth,
                           num_basis, dim_basis):
    layers = []
    for i in range(depth):
        key, k_op, k_sc = jax.random.split(key, 3)
        d_in = dim_input if i == 0 else dim_hidden
        op = init_cond_linear(k_op, d_in, dim_condition, dim_hidden, num_basis, dim_basis)
        sc = (init_cond_linear(k_sc, d_in, dim_condition, dim_hidden, num_basis, dim_basis)
              if d_in != dim_hidden else None)
        layers.append(dict(op=op, shortcut=sc))
    return layers


# ------------------------------- pure-JAX reference --------------------------------- #
def _cond_linear_ref(x, c, p, preactivate):
    if preactivate:
        x = _leaky(x)
    h0 = c @ p["w0"] + p["b0"]
    h1 = h0 + _leaky(h0) @ p["w1"] + p["b1"]
    bf = _leaky(h1) @ p["w2"] + p["b2"]
    w = jnp.einsum("nb,bio->nio", bf, p["W"])
    return jnp.einsum("ni,nio->no", x, w) + bf @ p["Bias"]


def _feature_extractor_ref(x, c, layers):
    for layer in layers:
        op_out = _cond_linear_ref(x, c, layer["op"], True)
        sc_out = (_cond_linear_ref(x, c, layer["shortcut"], False)
                  if layer["shortcut"] is not None else x)
        x = op_out + sc_out
    return _leaky(x)


# --------------------------------------- main ---------------------------------------- #
if __name__ == "__main__":
    # TODO(synk): dropout / layer_norm / spectral_norm are disabled by this config
    # (rate=0.0, layer_norm=False, spectral_norm=0.0) and therefore not implemented.
    batch, dim_input, dim_condition, dim_hidden = 8, 16, 8, 32
    depth, num_basis, dim_basis = 2, 4, 16

    key = jax.random.PRNGKey(0)
    k_x, k_c, k_p = jax.random.split(key, 3)
    x = jax.random.normal(k_x, (batch, dim_input), jnp.float32)
    c = jax.random.normal(k_c, (batch, dim_condition), jnp.float32)
    layers = init_feature_extractor(k_p, dim_input, dim_condition, dim_hidden,
                                    depth, num_basis, dim_basis)

    fused = prepare_fused_params(layers)          # one-time reshape/fuse of params
    out = conditional_feature_extractor(x, c, fused)
    out = jax.block_until_ready(out)

    ref = _feature_extractor_ref(x, c, layers)
    np.testing.assert_allclose(np.asarray(out), np.asarray(ref), rtol=1e-4, atol=1e-4)

    print("KERNEL_OK")
</pallas_src>

<mosaic_0001>
module attributes {stable_mosaic.version = 11 : i64} {
  func.func @_fused_extractor_kernel(%arg0: memref<8x16xf32, #tpu.memory_space<vmem>>, %arg1: memref<8x8xf32, #tpu.memory_space<vmem>>, %arg2: memref<8x32xf32, #tpu.memory_space<vmem>>, %arg3: memref<1x32xf32, #tpu.memory_space<vmem>>, %arg4: memref<32x32xf32, #tpu.memory_space<vmem>>, %arg5: memref<1x32xf32, #tpu.memory_space<vmem>>, %arg6: memref<32x8xf32, #tpu.memory_space<vmem>>, %arg7: memref<1x8xf32, #tpu.memory_space<vmem>>, %arg8: memref<17x128xf32, #tpu.memory_space<vmem>>, %arg9: memref<17x128xf32, #tpu.memory_space<vmem>>, %arg10: memref<8x16xf32, #tpu.memory_space<vmem>>, %arg11: memref<1x16xf32, #tpu.memory_space<vmem>>, %arg12: memref<16x16xf32, #tpu.memory_space<vmem>>, %arg13: memref<1x16xf32, #tpu.memory_space<vmem>>, %arg14: memref<16x4xf32, #tpu.memory_space<vmem>>, %arg15: memref<1x4xf32, #tpu.memory_space<vmem>>, %arg16: memref<33x128xf32, #tpu.memory_space<vmem>>, %arg17: memref<8x32xf32, #tpu.memory_space<vmem>>) attributes {dimension_semantics = [], scalar_prefetch = 0 : i64, scratch_operands = 0 : i64, tpu.core_type = #tpu.core_type<tc>} {
    %c0 = arith.constant 0 : index
    %c0_0 = arith.constant 0 : index
    %0 = vector.load %arg0[%c0, %c0_0] : memref<8x16xf32, #tpu.memory_space<vmem>>, vector<8x16xf32>
    %c0_1 = arith.constant 0 : index
    %c0_2 = arith.constant 0 : index
    %1 = vector.load %arg1[%c0_1, %c0_2] : memref<8x8xf32, #tpu.memory_space<vmem>>, vector<8x8xf32>
    %cst = arith.constant 1.000000e+00 : f32
    %2 = vector.broadcast %cst : f32 to vector<8x1xf32>
    %c0_3 = arith.constant 0 : index
    %c0_4 = arith.constant 0 : index
    %3 = vector.load %arg2[%c0_3, %c0_4] : memref<8x32xf32, #tpu.memory_space<vmem>>, vector<8x32xf32>
    %cst_5 = arith.constant dense<0.000000e+00> : vector<8x32xf32>
    %4 = tpu.matmul %1, %3, %cst_5 {dimension_numbers = #tpu.dot_dimension_numbers<[1], [0], [0], [1], [0, 0, 1, 1], [], []>} : vector<8x8xf32>, vector<8x32xf32>, vector<8x32xf32> -> vector<8x32xf32>
    %c0_6 = arith.constant 0 : index
    %c0_7 = arith.constant 0 : index
    %5 = vector.load %arg3[%c0_6, %c0_7] : memref<1x32xf32, #tpu.memory_space<vmem>>, vector<1x32xf32>
    %6 = vector.broadcast %5 : vector<1x32xf32> to vector<8x32xf32>
    %7 = arith.addf %4, %6 : vector<8x32xf32>
    %cst_8 = arith.constant 0.000000e+00 : f32
    %8 = vector.broadcast %cst_8 : f32 to vector<8x32xf32>
    %9 = arith.cmpf oge, %7, %8 : vector<8x32xf32>
    %cst_9 = arith.constant 0.00999999977 : f32
    %10 = vector.broadcast %cst_9 : f32 to vector<8x32xf32>
    %11 = arith.mulf %10, %7 : vector<8x32xf32>
    %12 = arith.select %9, %7, %11 : vector<8x32xi1>, vector<8x32xf32>
    %c0_10 = arith.constant 0 : index
    %c0_11 = arith.constant 0 : index
    %13 = vector.load %arg4[%c0_10, %c0_11] : memref<32x32xf32, #tpu.memory_space<vmem>>, vector<32x32xf32>
    %cst_12 = arith.constant dense<0.000000e+00> : vector<8x32xf32>
    %14 = tpu.matmul %12, %13, %cst_12 {dimension_numbers = #tpu.dot_dimension_numbers<[1], [0], [0], [1], [0, 0, 1, 1], [], []>} : vector<8x32xf32>, vector<32x32xf32>, vector<8x32xf32> -> vector<8x32xf32>
    %c0_13 = arith.constant 0 : index
    %c0_14 = arith.constant 0 : index
    %15 = vector.load %arg5[%c0_13, %c0_14] : memref<1x32xf32, #tpu.memory_space<vmem>>, vector<1x32xf32>
    %16 = vector.broadcast %15 : vector<1x32xf32> to vector<8x32xf32>
    %17 = arith.addf %14, %16 : vector<8x32xf32>
    %18 = arith.addf %7, %17 : vector<8x32xf32>
    %cst_15 = arith.constant 0.000000e+00 : f32
    %19 = vector.broadcast %cst_15 : f32 to vector<8x32xf32>
    %20 = arith.cmpf oge, %18, %19 : vector<8x32xf32>
    %cst_16 = arith.constant 0.00999999977 : f32
    %21 = vector.broadcast %cst_16 : f32 to vector<8x32xf32>
    %22 = arith.mulf %21, %18 : vector<8x32xf32>
    %23 = arith.select %20, %18, %22 : vector<8x32xi1>, vector<8x32xf32>
    %c0_17 = arith.constant 0 : index
    %c0_18 = arith.constant 0 : index
    %24 = vector.load %arg6[%c0_17, %c0_18] : memref<32x8xf32, #tpu.memory_space<vmem>>, vector<32x8xf32>
    %cst_19 = arith.constant dense<0.000000e+00> : vector<8x8xf32>
    %25 = tpu.matmul %23, %24, %cst_19 {dimension_numbers = #tpu.dot_dimension_numbers<[1], [0], [0], [1], [0, 0, 1, 1], [], []>} : vector<8x32xf32>, vector<32x8xf32>, vector<8x8xf32> -> vector<8x8xf32>
    %c0_20 = arith.constant 0 : index
    %c0_21 = arith.constant 0 : index
    %26 = vector.load %arg7[%c0_20, %c0_21] : memref<1x8xf32, #tpu.memory_space<vmem>>, vector<1x8xf32>
    %27 = vector.broadcast %26 : vector<1x8xf32> to vector<8x8xf32>
    %28 = arith.addf %25, %27 : vector<8x8xf32>
    %cst_22 = arith.constant 0.000000e+00 : f32
    %29 = vector.broadcast %cst_22 : f32 to vector<8x16xf32>
    %30 = arith.cmpf oge, %0, %29 : vector<8x16xf32>
    %cst_23 = arith.constant 0.00999999977 : f32
    %31 = vector.broadcast %cst_23 : f32 to vector<8x16xf32>
    %32 = arith.mulf %31, %0 : vector<8x16xf32>
    %33 = arith.select %30, %0, %32 : vector<8x16xi1>, vector<8x16xf32>
    %34 = tpu.concatenate %33, %2 in 1 : vector<8x16xf32>, vector<8x1xf32> -> vector<8x17xf32>
    %c0_24 = arith.constant 0 : index
    %c0_25 = arith.constant 0 : index
    %35 = vector.load %arg8[%c0_24, %c0_25] : memref<17x128xf32, #tpu.memory_space<vmem>>, vector<17x128xf32>
    %cst_26 = arith.constant dense<0.000000e+00> : vector<8x128xf32>
    %36 = tpu.matmul %34, %35, %cst_26 {dimension_numbers = #tpu.dot_dimension_numbers<[1], [0], [0], [1], [0, 0, 1, 1], [], []>} : vector<8x17xf32>, vector<17x128xf32>, vector<8x128xf32> -> vector<8x128xf32>
    %37 = vector.extract_strided_slice %28 {offsets = [0, 0], sizes = [8, 4], strides = [1, 1]} : vector<8x8xf32> to vector<8x4xf32>
    %38 = vector.extract_strided_slice %37 {offsets = [0, 0], sizes = [8, 1], strides = [1, 1]} : vector<8x4xf32> to vector<8x1xf32>
    %39 = vector.extract_strided_slice %36 {offsets = [0, 0], sizes = [8, 32], strides = [1, 1]} : vector<8x128xf32> to vector<8x32xf32>
    %40 = vector.broadcast %38 : vector<8x1xf32> to vector<8x32xf32>
    %41 = arith.mulf %40, %39 : vector<8x32xf32>
    %42 = vector.extract_strided_slice %37 {offsets = [0, 1], sizes = [8, 1], strides = [1, 1]} : vector<8x4xf32> to vector<8x1xf32>
    %43 = vector.extract_strided_slice %36 {offsets = [0, 32], sizes = [8, 32], strides = [1, 1]} : vector<8x128xf32> to vector<8x32xf32>
    %44 = vector.broadcast %42 : vector<8x1xf32> to vector<8x32xf32>
    %45 = arith.mulf %44, %43 : vector<8x32xf32>
    %46 = arith.addf %41, %45 : vector<8x32xf32>
    %47 = vector.extract_strided_slice %37 {offsets = [0, 2], sizes = [8, 1], strides = [1, 1]} : vector<8x4xf32> to vector<8x1xf32>
    %48 = vector.extract_strided_slice %36 {offsets = [0, 64], sizes = [8, 32], strides = [1, 1]} : vector<8x128xf32> to vector<8x32xf32>
    %49 = vector.broadcast %47 : vector<8x1xf32> to vector<8x32xf32>
    %50 = arith.mulf %49, %48 : vector<8x32xf32>
    %51 = arith.addf %46, %50 : vector<8x32xf32>
    %52 = vector.extract_strided_slice %37 {offsets = [0, 3], sizes = [8, 1], strides = [1, 1]} : vector<8x4xf32> to vector<8x1xf32>
    %53 = vector.extract_strided_slice %36 {offsets = [0, 96], sizes = [8, 32], strides = [1, 1]} : vector<8x128xf32> to vector<8x32xf32>
    %54 = vector.broadcast %52 : vector<8x1xf32> to vector<8x32xf32>
    %55 = arith.mulf %54, %53 : vector<8x32xf32>
    %56 = arith.addf %51, %55 : vector<8x32xf32>
    %57 = vector.extract_strided_slice %28 {offsets = [0, 4], sizes = [8, 4], strides = [1, 1]} : vector<8x8xf32> to vector<8x4xf32>
    %58 = tpu.concatenate %0, %2 in 1 : vector<8x16xf32>, vector<8x1xf32> -> vector<8x17xf32>
    %c0_27 = arith.constant 0 : index
    %c0_28 = arith.constant 0 : index
    %59 = vector.load %arg9[%c0_27, %c0_28] : memref<17x128xf32, #tpu.memory_space<vmem>>, vector<17x128xf32>
    %cst_29 = arith.constant dense<0.000000e+00> : vector<8x128xf32>
    %60 = tpu.matmul %58, %59, %cst_29 {dimension_numbers = #tpu.dot_dimension_numbers<[1], [0], [0], [1], [0, 0, 1, 1], [], []>} : vector<8x17xf32>, vector<17x128xf32>, vector<8x128xf32> -> vector<8x128xf32>
    %61 = vector.extract_strided_slice %57 {offsets = [0, 0], sizes = [8, 1], strides = [1, 1]} : vector<8x4xf32> to vector<8x1xf32>
    %62 = vector.extract_strided_slice %60 {offsets = [0, 0], sizes = [8, 32], strides = [1, 1]} : vector<8x128xf32> to vector<8x32xf32>
    %63 = vector.broadcast %61 : vector<8x1xf32> to vector<8x32xf32>
    %64 = arith.mulf %63, %62 : vector<8x32xf32>
    %65 = arith.addf %56, %64 : vector<8x32xf32>
    %66 = vector.extract_strided_slice %57 {offsets = [0, 1], sizes = [8, 1], strides = [1, 1]} : vector<8x4xf32> to vector<8x1xf32>
    %67 = vector.extract_strided_slice %60 {offsets = [0, 32], sizes = [8, 32], strides = [1, 1]} : vector<8x128xf32> to vector<8x32xf32>
    %68 = vector.broadcast %66 : vector<8x1xf32> to vector<8x32xf32>
    %69 = arith.mulf %68, %67 : vector<8x32xf32>
    %70 = arith.addf %65, %69 : vector<8x32xf32>
    %71 = vector.extract_strided_slice %57 {offsets = [0, 2], sizes = [8, 1], strides = [1, 1]} : vector<8x4xf32> to vector<8x1xf32>
    %72 = vector.extract_strided_slice %60 {offsets = [0, 64], sizes = [8, 32], strides = [1, 1]} : vector<8x128xf32> to vector<8x32xf32>
    %73 = vector.broadcast %71 : vector<8x1xf32> to vector<8x32xf32>
    %74 = arith.mulf %73, %72 : vector<8x32xf32>
    %75 = arith.addf %70, %74 : vector<8x32xf32>
    %76 = vector.extract_strided_slice %57 {offsets = [0, 3], sizes = [8, 1], strides = [1, 1]} : vector<8x4xf32> to vector<8x1xf32>
    %77 = vector.extract_strided_slice %60 {offsets = [0, 96], sizes = [8, 32], strides = [1, 1]} : vector<8x128xf32> to vector<8x32xf32>
    %78 = vector.broadcast %76 : vector<8x1xf32> to vector<8x32xf32>
    %79 = arith.mulf %78, %77 : vector<8x32xf32>
    %80 = arith.addf %75, %79 : vector<8x32xf32>
    %c0_30 = arith.constant 0 : index
    %c0_31 = arith.constant 0 : index
    %81 = vector.load %arg10[%c0_30, %c0_31] : memref<8x16xf32, #tpu.memory_space<vmem>>, vector<8x16xf32>
    %cst_32 = arith.constant dense<0.000000e+00> : vector<8x16xf32>
    %82 = tpu.matmul %1, %81, %cst_32 {dimension_numbers = #tpu.dot_dimension_numbers<[1], [0], [0], [1], [0, 0, 1, 1], [], []>} : vector<8x8xf32>, vector<8x16xf32>, vector<8x16xf32> -> vector<8x16xf32>
    %c0_33 = arith.constant 0 : index
    %c0_34 = arith.constant 0 : index
    %83 = vector.load %arg11[%c0_33, %c0_34] : memref<1x16xf32, #tpu.memory_space<vmem>>, vector<1x16xf32>
    %84 = vector.broadcast %83 : vector<1x16xf32> to vector<8x16xf32>
    %85 = arith.addf %82, %84 : vector<8x16xf32>
    %cst_35 = arith.constant 0.000000e+00 : f32
    %86 = vector.broadcast %cst_35 : f32 to vector<8x16xf32>
    %87 = arith.cmpf oge, %85, %86 : vector<8x16xf32>
    %cst_36 = arith.constant 0.00999999977 : f32
    %88 = vector.broadcast %cst_36 : f32 to vector<8x16xf32>
    %89 = arith.mulf %88, %85 : vector<8x16xf32>
    %90 = arith.select %87, %85, %89 : vector<8x16xi1>, vector<8x16xf32>
    %c0_37 = arith.constant 0 : index
    %c0_38 = arith.constant 0 : index
    %91 = vector.load %arg12[%c0_37, %c0_38] : memref<16x16xf32, #tpu.memory_space<vmem>>, vector<16x16xf32>
    %cst_39 = arith.constant dense<0.000000e+00> : vector<8x16xf32>
    %92 = tpu.matmul %90, %91, %cst_39 {dimension_numbers = #tpu.dot_dimension_numbers<[1], [0], [0], [1], [0, 0, 1, 1], [], []>} : vector<8x16xf32>, vector<16x16xf32>, vector<8x16xf32> -> vector<8x16xf32>
    %c0_40 = arith.constant 0 : index
    %c0_41 = arith.constant 0 : index
    %93 = vector.load %arg13[%c0_40, %c0_41] : memref<1x16xf32, #tpu.memory_space<vmem>>, vector<1x16xf32>
    %94 = vector.broadcast %93 : vector<1x16xf32> to vector<8x16xf32>
    %95 = arith.addf %92, %94 : vector<8x16xf32>
    %96 = arith.addf %85, %95 : vector<8x16xf32>
    %cst_42 = arith.constant 0.000000e+00 : f32
    %97 = vector.broadcast %cst_42 : f32 to vector<8x16xf32>
    %98 = arith.cmpf oge, %96, %97 : vector<8x16xf32>
    %cst_43 = arith.constant 0.00999999977 : f32
    %99 = vector.broadcast %cst_43 : f32 to vector<8x16xf32>
    %100 = arith.mulf %99, %96 : vector<8x16xf32>
    %101 = arith.select %98, %96, %100 : vector<8x16xi1>, vector<8x16xf32>
    %c0_44 = arith.constant 0 : index
    %c0_45 = arith.constant 0 : index
    %102 = vector.load %arg14[%c0_44, %c0_45] : memref<16x4xf32, #tpu.memory_space<vmem>>, vector<16x4xf32>
    %cst_46 = arith.constant dense<0.000000e+00> : vector<8x4xf32>
    %103 = tpu.matmul %101, %102, %cst_46 {dimension_numbers = #tpu.dot_dimension_numbers<[1], [0], [0], [1], [0, 0, 1, 1], [], []>} : vector<8x16xf32>, vector<16x4xf32>, vector<8x4xf32> -> vector<8x4xf32>
    %c0_47 = arith.constant 0 : index
    %c0_48 = arith.constant 0 : index
    %104 = vector.load %arg15[%c0_47, %c0_48] : memref<1x4xf32, #tpu.memory_space<vmem>>, vector<1x4xf32>
    %105 = vector.broadcast %104 : vector<1x4xf32> to vector<8x4xf32>
    %106 = arith.addf %103, %105 : vector<8x4xf32>
    %cst_49 = arith.constant 0.000000e+00 : f32
    %107 = vector.broadcast %cst_49 : f32 to vector<8x32xf32>
    %108 = arith.cmpf oge, %80, %107 : vector<8x32xf32>
    %cst_50 = arith.constant 0.00999999977 : f32
    %109 = vector.broadcast %cst_50 : f32 to vector<8x32xf32>
    %110 = arith.mulf %109, %80 : vector<8x32xf32>
    %111 = arith.select %108, %80, %110 : vector<8x32xi1>, vector<8x32xf32>
    %112 = tpu.concatenate %111, %2 in 1 : vector<8x32xf32>, vector<8x1xf32> -> vector<8x33xf32>
    %c0_51 = arith.constant 0 : index
    %c0_52 = arith.constant 0 : index
    %113 = vector.load %arg16[%c0_51, %c0_52] : memref<33x128xf32, #tpu.memory_space<vmem>>, vector<33x128xf32>
    %cst_53 = arith.constant dense<0.000000e+00> : vector<8x128xf32>
    %114 = tpu.matmul %112, %113, %cst_53 {dimension_numbers = #tpu.dot_dimension_numbers<[1], [0], [0], [1], [0, 0, 1, 1], [], []>} : vector<8x33xf32>, vector<33x128xf32>, vector<8x128xf32> -> vector<8x128xf32>
    %115 = vector.extract_strided_slice %106 {offsets = [0, 0], sizes = [8, 1], strides = [1, 1]} : vector<8x4xf32> to vector<8x1xf32>
    %116 = vector.extract_strided_slice %114 {offsets = [0, 0], sizes = [8, 32], strides = [1, 1]} : vector<8x128xf32> to vector<8x32xf32>
    %117 = vector.broadcast %115 : vector<8x1xf32> to vector<8x32xf32>
    %118 = arith.mulf %117, %116 : vector<8x32xf32>
    %119 = vector.extract_strided_slice %106 {offsets = [0, 1], sizes = [8, 1], strides = [1, 1]} : vector<8x4xf32> to vector<8x1xf32>
    %120 = vector.extract_strided_slice %114 {offsets = [0, 32], sizes = [8, 32], strides = [1, 1]} : vector<8x128xf32> to vector<8x32xf32>
    %121 = vector.broadcast %119 : vector<8x1xf32> to vector<8x32xf32>
    %122 = arith.mulf %121, %120 : vector<8x32xf32>
    %123 = arith.addf %118, %122 : vector<8x32xf32>
    %124 = vector.extract_strided_slice %106 {offsets = [0, 2], sizes = [8, 1], strides = [1, 1]} : vector<8x4xf32> to vector<8x1xf32>
    %125 = vector.extract_strided_slice %114 {offsets = [0, 64], sizes = [8, 32], strides = [1, 1]} : vector<8x128xf32> to vector<8x32xf32>
    %126 = vector.broadcast %124 : vector<8x1xf32> to vector<8x32xf32>
    %127 = arith.mulf %126, %125 : vector<8x32xf32>
    %128 = arith.addf %123, %127 : vector<8x32xf32>
    %129 = vector.extract_strided_slice %106 {offsets = [0, 3], sizes = [8, 1], strides = [1, 1]} : vector<8x4xf32> to vector<8x1xf32>
    %130 = vector.extract_strided_slice %114 {offsets = [0, 96], sizes = [8, 32], strides = [1, 1]} : vector<8x128xf32> to vector<8x32xf32>
    %131 = vector.broadcast %129 : vector<8x1xf32> to vector<8x32xf32>
    %132 = arith.mulf %131, %130 : vector<8x32xf32>
    %133 = arith.addf %128, %132 : vector<8x32xf32>
    %134 = arith.addf %133, %80 : vector<8x32xf32>
    %cst_54 = arith.constant 0.000000e+00 : f32
    %135 = vector.broadcast %cst_54 : f32 to vector<8x32xf32>
    %136 = arith.cmpf oge, %134, %135 : vector<8x32xf32>
    %cst_55 = arith.constant 0.00999999977 : f32
    %137 = vector.broadcast %cst_55 : f32 to vector<8x32xf32>
    %138 = arith.mulf %137, %134 : vector<8x32xf32>
    %139 = arith.select %136, %134, %138 : vector<8x32xi1>, vector<8x32xf32>
    %c0_56 = arith.constant 0 : index
    %c0_57 = arith.constant 0 : index
    %140 = vector.load %arg17[%c0_56, %c0_57] : memref<8x32xf32, #tpu.memory_space<vmem>>, vector<8x32xf32>
    tpu.vector_store %arg17[%c0_56, %c0_57], %139 {strides = array<i32>} : memref<8x32xf32, #tpu.memory_space<vmem>>, vector<8x32xf32>,
    return
  }
}

</mosaic_0001>

<bundles_post_ra>
// kernel: tpu_custom_call.1
= control target key start
LH: loop header
LB: loop body
LE: loop exit
PB: predicated region body
PF: predicated region fallthrough
CT: control target
= control target key end

     0   :  { %s1200_s0 = inlined_call_operand.hbm [shape: f32[8,16], index: 0, kind: input, shape index: {}]   ;;  %s1201_s1 = inlined_call_operand.hbm [shape: f32[8,8], index: 1, kind: input, shape index: {}]   ;;  %s1202_s2 = inlined_call_operand.hbm [shape: f32[8,32], index: 2, kind: input, shape index: {}]   ;;  %s1203_s3 = inlined_call_operand.vmem [shape: f32[1,32], index: 3, kind: input, shape index: {}]   ;;  %s1204_s4 = inlined_call_operand.vmem [shape: f32[32,32], index: 4, kind: input, shape index: {}]   ;;  %s1205_s5 = inlined_call_operand.vmem [shape: f32[1,32], index: 5, kind: input, shape index: {}]   ;;  %s1206_s6 = inlined_call_operand.vmem [shape: f32[32,8], index: 6, kind: input, shape index: {}]   ;;  %s1207_s7 = inlined_call_operand.vmem [shape: f32[1,8], index: 7, kind: input, shape index: {}]   ;;  %s1208_s8 = inlined_call_operand.hbm [shape: f32[17,128], index: 8, kind: input, shape index: {}]   ;;  %s1209_s9 = inlined_call_operand.hbm [shape: f32[17,128], index: 9, kind: input, shape index: {}]   ;;  %s1210_s10 = inlined_call_operand.hbm [shape: f32[8,16], index: 10, kind: input, shape index: {}]   ;;  %s1211_s11 = inlined_call_operand.hbm [shape: f32[1,16], index: 11, kind: input, shape index: {}]   ;;  %s1212_s12 = inlined_call_operand.hbm [shape: f32[16,16], index: 12, kind: input, shape index: {}]   ;;  %s1213_s13 = inlined_call_operand.hbm [shape: f32[1,16], index: 13, kind: input, shape index: {}]   ;;  %s1214_s14 = inlined_call_operand.vmem [shape: f32[16,4], index: 14, kind: input, shape index: {}]   ;;  %s1215_s15 = inlined_call_operand.hbm [shape: f32[1,4], index: 15, kind: input, shape index: {}]   ;;  %s1216_s16 = inlined_call_operand.vmem [shape: f32[33,128], index: 16, kind: input, shape index: {}]   ;;  %s1217_s17 = inlined_call_operand.hbm [shape: f32[8,32], index: 17, kind: output, shape index: {}]  }
   0x1   :  { %1218 = sst [smem:[#allocation27_spill]] %s1200_s0 }
   0x2   :  { %1219 = sst [smem:[#allocation28_spill]] %s1201_s1 }
   0x3   :  { %1220 = sst [smem:[#allocation29_spill]] %s1217_s17 }
   0x4   :  { %22 = vsyncpa [#allocation3], 0 }
   0x5   :  { %23 = vsyncpa [#allocation6], 0 }
   0x6   :  { %24 = vsyncpa [#allocation9], 0 }
   0x7   :  { %25 = vsyncpa [#allocation12], 0 }
   0x8   :  { %26 = vsyncpa [#allocation15], 0 }
   0x9   :  { %27 = vsyncpa [#allocation18], 0  ;;  %s1221_s26 = sld [smem:[#allocation28_spill]] }
   0xf   :  { %s45_s27 = sshll.u32 %s1221_s26, 4  ;;  %s46_s27 = int_to_ptr.hbm [resolvable:$true] %s45_s27 }
  0x10   :  { %28 = vsyncpa [#allocation4], 0  ;;  %s960_s28 = smov [#allocation5]   ;;  %s76_s18 = sshll.u32 %s1208_s8, 4  ;;  %s77_s18 = int_to_ptr.hbm [resolvable:$true] %s76_s18 }
  0x11   :  { %s47_s29 = sshll.u32 %s960_s28, 4  ;;  %s961_s19 = smov [#allocation8]   ;;  %s48_s29 = int_to_ptr.vmem [resolvable:$true] %s47_s29 }
  0x12   :  { %50 = dma.hbm_to_vmem [thread:$0]  %s46_s27, 128, %s48_s29, [#allocation6]  }
  0x13   :  { %s78_s1 = sshll.u32 %s961_s19, 4  ;;  %s962_s20 = smov 128   ;;  %s79_s1 = int_to_ptr.vmem [resolvable:$true] %s78_s1 }
  0x14   :  { %s963_s21 = smov 8   ;;  %s103_s24 = sshll.u32 %s1210_s10, 4  ;;  %s104_s24 = int_to_ptr.hbm [resolvable:$true] %s103_s24 }
  0x15   :  { %84 = dma.hbm_to_vmem [thread:$0]  %s77_s18, 384, %s79_s1, [#allocation9], %s962_s20, %s962_s20, %s963_s21  }
  0x16   :  { %s964_s25 = smov [#allocation11]   ;;  %s124_s28 = sshll.u32 %s1212_s12, 4  ;;  %s125_s28 = int_to_ptr.hbm [resolvable:$true] %s124_s28 }
  0x17   :  { %s105_s26 = sshll.u32 %s964_s25, 4  ;;  %s965_s29 = smov [#allocation14]   ;;  %s106_s26 = int_to_ptr.vmem [resolvable:$true] %s105_s26 }
  0x18   :  { %108 = dma.hbm_to_vmem [thread:$0]  %s104_s24, 128, %s106_s26, [#allocation12]  }
  0x19   :  { %s126_s0 = sshll.u32 %s965_s29, 4  ;;  %s1222_s17 = sld [smem:[#allocation27_spill]]  ;;  %s127_s0 = int_to_ptr.vmem [resolvable:$true] %s126_s0 }
  0x1a   :  { %132 = dma.hbm_to_vmem [thread:$0]  %s125_s28, 256, %s127_s0, [#allocation15], %s962_s20, %s962_s20, %s963_s21  }
  0x1b   :  { %s56_s22 = sshll.u32 %s1202_s2, 4  ;;  %s966_s23 = smov [#allocation2]   ;;  %s57_s22 = int_to_ptr.hbm [resolvable:$true] %s56_s22 }
  0x1c   :  { %s36_s12 = sshll.u32 %s966_s23, 4  ;;  %s967_s24 = smov [#allocation7]   ;;  %s37_s12 = int_to_ptr.vmem [resolvable:$true] %s36_s12 }
  0x1d   :  { %s58_s25 = sshll.u32 %s967_s24, 4  ;;  %s114_s29 = sshll.u32 %s1211_s11, 4  ;;  %s59_s25 = int_to_ptr.vmem [resolvable:$true] %s58_s25  ;;  %s115_s29 = int_to_ptr.hbm [resolvable:$true] %s114_s29 }
  0x1e   :  { %61 = dma.hbm_to_vmem [thread:$0]  %s57_s22, 128, %s59_s25, [#allocation6]  }
  0x1f   :  { %s34_s18 = sshll.u32 %s1222_s17, 4  ;;  %s89_s17 = sshll.u32 %s1209_s9, 4  ;;  %s35_s18 = int_to_ptr.hbm [resolvable:$true] %s34_s18  ;;  %s90_s17 = int_to_ptr.hbm [resolvable:$true] %s89_s17 }
  0x20   :  { %39 = dma.hbm_to_vmem [thread:$0]  %s35_s18, 128, %s37_s12, [#allocation3]  }
  0x21   :  { %s968_s0 = smov [#allocation10]   ;;  %s969_s30 = smov [#allocation13]  }
  0x22   :  { %s91_s2 = sshll.u32 %s968_s0, 4  ;;  %s116_s19 = sshll.u32 %s969_s30, 4  ;;  %s92_s2 = int_to_ptr.vmem [resolvable:$true] %s91_s2  ;;  %s117_s19 = int_to_ptr.vmem [resolvable:$true] %s116_s19 }
  0x23   :  { %97 = dma.hbm_to_vmem [thread:$0]  %s90_s17, 384, %s92_s2, [#allocation9], %s962_s20, %s962_s20, %s963_s21  }
  0x24   :  { %s138_s9 = sshll.u32 %s1213_s13, 4  ;;  %s151_s11 = sshll.u32 %s1215_s15, 4  ;;  %s139_s9 = int_to_ptr.hbm [resolvable:$true] %s138_s9  ;;  %s152_s11 = int_to_ptr.hbm [resolvable:$true] %s151_s11 }
  0x25   :  { %119 = dma.hbm_to_vmem [thread:$0]  %s115_s29, 16, %s117_s19, [#allocation12]  }
  0x26   :  { %s970_s23 = smov [#allocation16]   ;;  %s971_s24 = smov [#allocation17]  }
  0x27   :  { %s140_s12 = sshll.u32 %s970_s23, 4  ;;  %s153_s20 = sshll.u32 %s971_s24, 4  ;;  %s141_s12 = int_to_ptr.vmem [resolvable:$true] %s140_s12  ;;  %s154_s20 = int_to_ptr.vmem [resolvable:$true] %s153_s20 }
  0x28   :  { %143 = dma.hbm_to_vmem [thread:$0]  %s139_s9, 16, %s141_s12, [#allocation15]  }
  0x29   :  { %156 = dma.hbm_to_vmem [thread:$0]  %s152_s11, 16, %s154_s20, [#allocation18]  }
  0x2a   :  { %946 = dma.done.wait [#allocation3], 128  }
  0x2b   :  { %947 = vsyncadd [#allocation3], 4294967168 }
  0x2c   :  { %948 = dma.done.wait [#allocation6], 256  }
  0x2d   :  { %949 = vsyncadd [#allocation6], 4294967040 }
  0x2e   :  { %950 = dma.done.wait [#allocation9], 768  }
  0x2f   :  { %951 = vsyncadd [#allocation9], 4294966528 }
  0x30   :  { %952 = dma.done.wait [#allocation12], 144  }
  0x31   :  { %953 = vsyncadd [#allocation12], 4294967152 }
  0x32   :  { %954 = dma.done.wait [#allocation15], 272  }
  0x33   :  { %955 = vsyncadd [#allocation15], 4294967024 }
  0x34   :  { %956 = dma.done.wait [#allocation18], 16  }
  0x35   :  { %957 = vsyncadd [#allocation18], 4294967280  ;;  %vm206_vm0 = vcmask 64512   ;;  %v201_v0 = vld [vmem:[#allocation7] sm:$0xff]  ;;  %v200_v1 = vld [vmem:[#allocation5] sm:$0xff]  ;;  %vm312_vm1 = vcmask 1040384  }
  0x36   :  { %v307_v2 = vld [vmem:[#allocation8 + $0x10] sm:$0x1]  ;;  %225 = vmatpush.msra.mxu3 %v201_v0  ;;  %v306_v3 = vld [vmem:[#allocation8 + $0x8] sm:$0xff]  ;;  %v236_v6 = vld [vmem:[%s1204_s4 + $0x18] sm:$0xff]  ;;  %vm303_vm3 = vcmask 130048   ;;  %vm308_vm4 = vcmask 138240  }
  0x37   :  { %v199_v4 = vld [vmem:[#allocation2] sm:$0xff]  ;;  %627 = vmatmul.msk.f32.vlgmr.msra.gmra.mxu3 %vm206_vm0, %v200_v1  ;;  %v305_v7 = vld [vmem:[#allocation8] sm:$0xff]  ;;  %257 = vmatpush.msra.mxu1 %v236_v6  ;;  %v235_v10 = vld [vmem:[%s1204_s4 + $0x10] sm:$0xff]  ;;  %vm241_vm6 = vcmask 261120   ;;  %v972_v49 = vmov 6   ;;  %v973_v50 = vmov 3  }
  0x38   :  { %vm300_vm2 = vcmp.ge.f32.partialorder %v199_v4, 0.0  ;;  %v301_v5 = vmul.f32 0.01, %v199_v4  ;;  %630 = vmatpush.msk.msrb.mxu3 %vm312_vm1, %v307_v2  ;;  %v438_v11 = vld [vmem:[#allocation11] sm:$0xff]  ;;  %v233_v13 = vld [vmem:[%s1204_s4] sm:$0xff]  ;;  %v272_v20 = vld [vmem:[%s1206_s6 + $0x18] sm:$0xff]  ;;  %667 = vset.pattern.permute.xlu2 %v972_v49 }
  0x39   :  { %258 = vmatpush.msra.mxu1 %v235_v10  ;;  %v234_v12 = vld [vmem:[%s1204_s4 + $0x8] sm:$0xff]  ;;  %v676_v14 = vld [vmem:[%s1203_s3] ss:$0 sm:$0xff]  ;;  %292 = vmatpush.msra.mxu2 %v272_v20  ;;  %v678_v21 = vld [vmem:[#allocation13] ss:$0 sm:$0xff]  ;;  %v372_v34 = vsel %vm303_vm3, %v199_v4, 1.0 }
  0x3a   :  { %v302_v8 = vsel %vm300_vm2, %v199_v4, %v301_v5  ;;  %330 = vmatpush.msrb.mxu3 %v306_v3  ;;  %v271_v23 = vld [vmem:[%s1206_s6 + $0x10] sm:$0xff]  ;;  %v270_v25 = vld [vmem:[%s1206_s6 + $0x8] sm:$0xff]  ;;  %v467_v26 = vld [vmem:[#allocation14 + $0x8] sm:$0xff]  ;;  %665 = vset.pattern.permute.xlu1 %v973_v50  ;;  %v974_v51 = vmov 1   ;;  %v975_v55 = vmov 7   ;;  %v976_v56 = vmov 5  }
  0x3b   :  { %v304_v9 = vsel %vm303_vm3, %v302_v8, 1.0  ;;  %259 = vmatpush.msra.mxu1 %v234_v12  ;;  %293 = vmatpush.msra.mxu2 %v271_v23  ;;  %v269_v27 = vld [vmem:[%s1206_s6] sm:$0xff]  ;;  %v466_v28 = vld [vmem:[#allocation14] sm:$0xff]  ;;  %v500_v41 = vld [vmem:[%s1214_s14 + $0x8] sm:$0xff]  ;;  %v977_v57 = vmov 2   ;;  %v978_v58 = vmov 0  }
  0x3c   :  { %331 = vmatpush.msrb.mxu3 %v305_v7  ;;  %v375_v31 = vld [vmem:[#allocation10 + $0x10] sm:$0x1]  ;;  %v374_v32 = vld [vmem:[#allocation10 + $0x8] sm:$0xff]  ;;  %v373_v33 = vld [vmem:[#allocation10] sm:$0xff]  ;;  %663 = vset.pattern.permute.xlu0 %v974_v51  ;;  %v979_v59 = vmov 4   ;;  %s982_s24 = smov 64  }
  0x3d   :  { %260 = vmatpush.msra.mxu1 %v233_v13  ;;  %294 = vmatpush.msra.mxu2 %v270_v25  ;;  %v677_v35 = vld [vmem:[%s1205_s5] ss:$0 sm:$0xff]  ;;  %v679_v42 = vld [vmem:[#allocation16] ss:$0 sm:$0xff]  ;;  %v681_v5 = vld [vmem:[#allocation17] ss:$0 sm:$0xff] }
  0x3e   :  { %458 = vmatpush.msra.mxu3 %v438_v11  ;;  %632 = vmatpush.msk.msra.mxu0 %vm312_vm1, %v375_v31  ;;  %v499_v47 = vld [vmem:[%s1214_s14] sm:$0xff]  ;;  %s981_s14 = smov 96   ;;  %v535_v13 = vld [vmem:[%s1216_s16 + $0x18] sm:$0xff]  ;;  %vm537_vm11 = vcmask 269312   ;;  %s1223_s4 = sld [smem:[#allocation29_spill]] }
  0x3f   :  { %631 = vmatmul.msk.f32.vlgmr.msrb.gmra.mxu3 %vm308_vm4, %v304_v9  ;;  %489 = vmatpush.msrb.mxu1 %v467_v26  ;;  %v680_v52 = vld [vmem:[%s1207_s7] ss:$0 sm:$0xff]  ;;  %s980_s7 = smov 32  }
  0x40   :  { %295 = vmatpush.msra.mxu2 %v269_v27  ;;  %396 = vmatpush.msra.mxu0 %v374_v32  ;;  %v536_v12 = vld [vmem:[%s1216_s16 + $0x20] sm:$0x1] }
  0x41   :  { %490 = vmatpush.msrb.mxu1 %v466_v28 }
  0x42   :  { %397 = vmatpush.msra.mxu0 %v373_v33  ;;  %522 = vmatpush.msrb.mxu2 %v500_v41 }
  0x43   :  { %633 = vmatmul.msk.f32.vlgmr.msra.gmra.mxu0 %vm308_vm4, %v372_v34 }
  0x44   :  { %523 = vmatpush.msrb.mxu2 %v499_v47  ;;  %637 = vmatpush.msk.msrb.mxu0 %vm312_vm1, %v536_v12  ;;  %s612_s30 = sshll.u32 %s1223_s4, 4  ;;  %s613_s30 = int_to_ptr.hbm [resolvable:$true] %s612_s30 }
  0x46   :  { %556 = vmatpush.msrb.mxu0 %v535_v13 }
  0x47   :  { %634 = vmatmul.msk.f32.vlgmr.msra.gmra.mxu3 %vm206_vm0, %v200_v1 }
  0xba   :  { %v227_v15 = vpop.f32.mrf.mxu3 }
  0xbb   :  { %v228_v16 = vadd.f32 %v676_v14, %v227_v15  ;;  %v534_v14 = vld [vmem:[%s1216_s16 + $0x10] sm:$0xff]  ;;  %v533_v15 = vld [vmem:[%s1216_s16 + $0x8] sm:$0xff] }
  0xbc   :  { %557 = vmatpush.msrb.mxu0 %v534_v14 }
  0xbd   :  { %vm230_vm5 = vcmp.ge.f32.partialorder %v228_v16, 0.0  ;;  %v231_v17 = vmul.f32 0.01, %v228_v16 }
  0xbe   :  { %558 = vmatpush.msrb.mxu0 %v533_v15 }
  0xbf   :  { %v232_v18 = vsel %vm230_vm5, %v228_v16, %v231_v17 }
  0xc0   :  { %628 = vmatmul.msk.f32.vlgmr.msra.gmra.mxu1 %vm241_vm6, %v232_v18  ;;  %v399_v1 = vpop.f32.mrf.mxu0 }
  0xc2   :  { %v1134_v19 = vpop.f32.mrf.mxu3 }
  0xca   :  { %v460_v22 = vpop.f32.mrf.mxu3 }
  0xcb   :  { %v461_v24 = vadd.f32 %v678_v21, %v460_v22 }
  0xcd   :  { %v464_v29 = vmul.f32 0.01, %v461_v24  ;;  %vm463_vm7 = vcmp.ge.f32.partialorder %v461_v24, 0.0 }
  0xcf   :  { %v465_v30 = vsel %vm463_vm7, %v461_v24, %v464_v29 }
  0xd0   :  { %635 = vmatmul.msk.f32.vlgmr.msrb.gmra.mxu1 %vm303_vm3, %v465_v30 }
 0x13d   :  { %v262_v36 = vpop.f32.mrf.mxu1 }
 0x13e   :  { %v263_v37 = vadd.f32 %v677_v35, %v262_v36 }
 0x140   :  { %v265_v38 = vadd.f32 %v263_v37, %v228_v16  ;;  %v532_v16 = vld [vmem:[%s1216_s16] sm:$0xff]  ;;  %s983_s16 = smov [#allocation19]  }
 0x141   :  { %559 = vmatpush.msrb.mxu0 %v532_v16  ;;  %s610_s29 = sshll.u32 %s983_s16, 4  ;;  %s611_s29 = int_to_ptr.vmem [resolvable:$true] %s610_s29 }
 0x142   :  { %vm266_vm8 = vcmp.ge.f32.partialorder %v265_v38, 0.0  ;;  %v267_v39 = vmul.f32 0.01, %v265_v38 }
 0x144   :  { %v268_v40 = vsel %vm266_vm8, %v265_v38, %v267_v39 }
 0x145   :  { %629 = vmatmul.msk.f32.vlgmr.msra.gmra.mxu2 %vm241_vm6, %v268_v40 }
 0x14d   :  { %v492_v43 = vpop.f32.mrf.mxu1 }
 0x14e   :  { %v493_v44 = vadd.f32 %v679_v42, %v492_v43 }
 0x150   :  { %v495_v45 = vadd.f32 %v493_v44, %v461_v24 }
 0x152   :  { %v497_v46 = vmul.f32 0.01, %v495_v45  ;;  %vm496_vm9 = vcmp.ge.f32.partialorder %v495_v45, 0.0 }
 0x154   :  { %v498_v48 = vsel %vm496_vm9, %v495_v45, %v497_v46 }
 0x155   :  { %636 = vmatmul.msk.f32.vlgmr.msrb.gmra.mxu2 %vm303_vm3, %v498_v48 }
 0x1c8   :  { %v297_v53 = vpop.f32.mrf.mxu2 }
 0x1c9   :  { %v298_v54 = vadd.f32 %v680_v52, %v297_v53 }
 0x1cb   :  { %419 = vperm.xlu2 %667, %v298_v54   ;;  %363 = vperm.xlu1 %665, %v298_v54  }
 0x1cc   :  { %343 = vperm.xlu0 %663, %v298_v54  }
 0x1d3   :  { %668 = vset.pattern.permute.xlu2 %v975_v55  ;;  %666 = vset.pattern.permute.xlu1 %v976_v56 }
 0x1d4   :  { %664 = vset.pattern.permute.xlu0 %v977_v57  ;;  %429 = vperm.xlu2 %668, %v298_v54  }
 0x1d5   :  { %409 = vperm.xlu1 %666, %v298_v54   ;;  %353 = vperm.xlu0 %664, %v298_v54  }
 0x1d8   :  { %v525_v6 = vpop.f32.mrf.mxu2 }
 0x1d9   :  { %v526_v8 = vadd.f32 %v681_v5, %v525_v6 }
 0x1dc   :  { %670 = vset.pattern.permute.xlu2 %v979_v59 }
 0x1dd   :  { %669 = vset.pattern.permute.xlu1 %v978_v58  ;;  %671 = vset.pattern.permute.xlu0 %v974_v51 }
 0x1de   :  { %338 = vperm.xlu1 %669, %v298_v54  }
 0x1e6   :  { %672 = vset.pattern.permute.xlu1 %v977_v57 }
 0x225   :  { %v420_v0 = vpop.permute.xlu2 %419 }
 0x226   :  { %v422_v2 = vmul.f32 %v420_v0, %v399_v1 }
 0x22e   :  { %v430_v7 = vpop.permute.xlu2 %429 }
 0x22f   :  { %v432_v10 = vmul.f32 %v430_v7, %v399_v1 }
 0x23d   :  { %v364_v60 = vpop.permute.xlu1 %363 }
 0x23e   :  { %v366_v61 = vmul.f32 %v364_v60, %v1134_v19  ;;  %v344_v62 = vpop.permute.xlu0 %343 }
 0x23f   :  { %v346_v63 = vmul.f32 %v344_v62, %v1134_v19 }
 0x240   :  { %368 = vrot.lane.b32.xlu1 %v366_v61, %s980_s7 }
 0x241   :  { %348 = vrot.lane.b32.xlu2 %v346_v63, %s981_s14 }
 0x247   :  { %v354_v3 = vpop.permute.xlu0 %353  ;;  %v410_v9 = vpop.permute.xlu1 %409 }
 0x248   :  { %v356_v4 = vmul.f32 %v354_v3, %v1134_v19  ;;  %424 = vrot.lane.b32.xlu1 %v422_v2, %s982_s24  ;;  %v412_v11 = vmul.f32 %v410_v9, %v399_v1 }
 0x249   :  { %403 = vperm.xlu2 %670, %v298_v54  }
 0x24a   :  { %358 = vrot.lane.b32.xlu0 %v356_v4, %s982_s24 }
 0x250   :  { %581 = vperm.xlu1 %672, %v526_v8   ;;  %v339_v17 = vpop.permute.xlu1 %338 }
 0x251   :  { %434 = vrot.lane.b32.xlu2 %v432_v10, %s980_s7  ;;  %v341_v20 = vmul.f32 %v339_v17, %v1134_v19 }
 0x252   :  { %414 = vrot.lane.b32.xlu0 %v412_v11, %s981_s14  ;;  %673 = vset.pattern.permute.xlu2 %v973_v50 }
 0x258   :  { %674 = vset.pattern.permute.xlu1 %v978_v58 }
 0x259   :  { %591 = vperm.xlu2 %673, %v526_v8   ;;  %566 = vperm.xlu1 %674, %v526_v8  }
 0x25a   :  { %571 = vperm.xlu0 %671, %v526_v8  }
 0x262   :  { %675 = vset.pattern.permute.xlu0 %v973_v50 }
 0x29b   :  { %v349_v18 = vpop.permute.xlu2 %348 }
 0x29c   :  { %v351_v21 = vadd.f32 %v349_v18, %v341_v20 }
 0x2a3   :  { %v404_v25 = vpop.permute.xlu2 %403 }
 0x2a4   :  { %v406_v27 = vmul.f32 %v404_v25, %v399_v1 }
 0x2ab   :  { %v435_v33 = vpop.permute.xlu2 %434 }
 0x2b2   :  { %v369_v22 = vpop.permute.xlu1 %368 }
 0x2b3   :  { %v592_v37 = vpop.permute.xlu2 %591 }
 0x2ba   :  { %v425_v31 = vpop.permute.xlu1 %424 }
 0x2bc   :  { %v359_v23 = vpop.permute.xlu0 %358 }
 0x2bd   :  { %v361_v24 = vadd.f32 %v359_v23, %v351_v21 }
 0x2bf   :  { %v371_v26 = vadd.f32 %v369_v22, %v361_v24 }
 0x2c1   :  { %v407_v28 = vadd.f32 %v406_v27, %v371_v26 }
 0x2c2   :  { %v582_v38 = vpop.permute.xlu1 %581 }
 0x2c4   :  { %v415_v29 = vpop.permute.xlu0 %414 }
 0x2c5   :  { %v417_v30 = vadd.f32 %v415_v29, %v407_v28 }
 0x2c7   :  { %v427_v32 = vadd.f32 %v425_v31, %v417_v30 }
 0x2c9   :  { %v437_v34 = vadd.f32 %v435_v33, %v427_v32 }
 0x2cb   :  { %vm528_vm10 = vcmp.ge.f32.partialorder %v437_v34, 0.0  ;;  %v529_v35 = vmul.f32 0.01, %v437_v34  ;;  %v567_v44 = vpop.permute.xlu1 %566 }
 0x2cc   :  { %v572_v39 = vpop.permute.xlu0 %571 }
 0x2cd   :  { %v530_v36 = vsel %vm528_vm10, %v437_v34, %v529_v35 }
 0x2ce   :  { %v531_v19 = vsel %vm241_vm6, %v530_v36, 1.0 }
 0x2cf   :  { %638 = vmatmul.msk.f32.vlgmr.msrb.gmra.mxu0 %vm537_vm11, %v531_v19 }
 0x34c   :  { %v561_v40 = vpop.f32.mrf.mxu0 }
 0x34d   :  { %v574_v41 = vmul.f32 %v572_v39, %v561_v40  ;;  %v584_v42 = vmul.f32 %v582_v38, %v561_v40  ;;  %v594_v43 = vmul.f32 %v592_v37, %v561_v40  ;;  %v569_v46 = vmul.f32 %v567_v44, %v561_v40 }
 0x34f   :  { %596 = vrot.lane.b32.xlu1 %v594_v43, %s980_s7  ;;  %586 = vrot.lane.b32.xlu0 %v584_v42, %s982_s24 }
 0x350   :  { %576 = vrot.lane.b32.xlu2 %v574_v41, %s981_s14 }
 0x3aa   :  { %v577_v45 = vpop.permute.xlu2 %576 }
 0x3ab   :  { %v579_v47 = vadd.f32 %v577_v45, %v569_v46 }
 0x3c1   :  { %v587_v48 = vpop.permute.xlu0 %586  ;;  %v597_v50 = vpop.permute.xlu1 %596 }
 0x3c2   :  { %v589_v49 = vadd.f32 %v587_v48, %v579_v47 }
 0x3c4   :  { %v599_v51 = vadd.f32 %v597_v50, %v589_v49 }
 0x3c6   :  { %v600_v52 = vadd.f32 %v599_v51, %v437_v34 }
 0x3c8   :  { %v602_v53 = vmul.f32 0.01, %v600_v52  ;;  %vm601_vm12 = vcmp.ge.f32.partialorder %v600_v52, 0.0 }
 0x3ca   :  { %v603_v54 = vsel %vm601_vm12, %v600_v52, %v602_v53 }
 0x3cb   :  { %604 = vst.msk [vmem:[#allocation19] sm:$0xff] %vm241_vm6, %v603_v54 }
 0x3cc   :  { %615 = dma.vmem_to_hbm [thread:$0]  %s611_s29, 128, %s613_s30, [#allocation4]  }
 0x3cd   :  { %958 = dma.done.wait [#allocation4], 128  }
 0x3ce   :  { %959 = vsyncadd [#allocation4], 4294967168 }
 0x3cf   :  { %620 = vsyncpa [#allocation3], 1 }
 0x3d0   :  { %621 = vsyncpa [#allocation6], 1 }
 0x3d1   :  { %622 = vsyncpa [#allocation9], 1 }
 0x3d2   :  { %623 = vsyncpa [#allocation12], 1 }
 0x3d3   :  { %624 = vsyncpa [#allocation15], 1 }
 0x3d4   :  { %625 = vsyncpa [#allocation18], 1 }
 0x3d5   :  { %626 = vsyncpa [#allocation4], 1 }

</bundles_post_ra>
